<compile_context>
chip_gen: v7x
topology: tpu7x:2x2x1
jax: 0.10.0
libtpu: 0.0.40
codegen_flags: <defaults>
</compile_context>

<pallas_src>
import functools

import jax
import jax.numpy as jnp
from jax.experimental import pallas as pl
from jax.experimental.pallas import tpu as pltpu


def _spatial_softmax_kernel(scale_ref, bias_ref, x_ref, o_ref, *,
                            hw_valid, hw_padded):
    # scale_ref / bias_ref: (1,) scalars in SMEM.
    # x_ref / o_ref: (row_tile, hw_padded) tiles in VMEM.
    scale = scale_ref[0]
    bias = bias_ref[0]

    z = scale * jnp.maximum(x_ref[...], 0.0) + bias     # exp(temp)*relu(x)+bias

    if hw_valid != hw_padded:
        # Lane-padded columns must not contribute to max/sum; they store 0
        # (exp(-inf - m) == 0) and are sliced away in the wrapper.
        lane = jax.lax.broadcasted_iota(jnp.int32, z.shape, dimension=1)
        z = jnp.where(lane < hw_valid, z, -jnp.inf)

    m = jnp.max(z, axis=-1, keepdims=True)               # stable softmax
    e = jnp.exp(z - m)
    denom = jnp.sum(e, axis=-1, keepdims=True)
    o_ref[...] = e * pl.reciprocal(denom, approx=False)


def _vmem_capacity_bytes():
    try:
        return int(pltpu.get_tpu_info().vmem_capacity_bytes)
    except Exception:
        return 64 << 20   # conservative fallback (v7x per-TC physical VMEM)


def _choose_row_tile(rows, hw_padded, vmem_capacity):
    """Largest row tile that fits a safe VMEM budget, sublane-aligned."""
    if rows < 8:
        return rows   # block equal to the full dim is always legal
    # Double-buffered input + output, f32.
    bytes_per_row = 2 * 2 * hw_padded * 4
    budget = min(vmem_capacity // 4, 32 << 20)
    max_by_vmem = max(8, budget // bytes_per_row)
    # Keep >= ~8 grid steps so the "parallel" axis load-balances across
    # TensorCores (v7x has 2 TCs per chip).
    max_by_grid = max(8, rows // 8)
    tile = min(2048, max_by_vmem, max_by_grid, rows)
    return max(8, (tile // 8) * 8)


def spatial_softmax(x, temp, bias, *, row_tile=None):
    """x: (B, C, H, W) float32. temp, bias: scalar float32 params."""
    B, C, H, W = x.shape
    HW = H * W
    rows = B * C
    x2 = x.reshape(rows, HW)

    # Lane-pad HW to a multiple of 128 so output stores are full-width vst
    # (masked inside the kernel for correctness of the softmax denominator).
    hw_padded = ((HW + 127) // 128) * 128
    if hw_padded != HW:
        x2 = jnp.pad(x2, ((0, 0), (0, hw_padded - HW)))

    vmem_capacity = _vmem_capacity_bytes()
    if row_tile is None:
        row_tile = _choose_row_tile(rows, hw_padded, vmem_capacity)

    # Scoped VMEM: cover the double-buffered tiles plus headroom.
    step_bytes = 2 * 2 * row_tile * hw_padded * 4
    vmem_limit = max(step_bytes + (4 << 20), 16 << 20)
    vmem_limit = min(vmem_limit, (vmem_capacity * 3) // 4)

    # exp(temp) hoisted out of the kernel: pass the scale directly.
    scale_arr = jnp.exp(jnp.asarray(temp, dtype=jnp.float32)).reshape(1)
    bias_arr = jnp.asarray(bias, dtype=jnp.float32).reshape(1)

    # No row padding: ragged edge block is handled by the cdiv grid; rows are
    # independent and out-of-bounds edge writes are masked by Pallas.
    grid = (pl.cdiv(rows, row_tile),)

    kernel = functools.partial(
        _spatial_softmax_kernel, hw_valid=HW, hw_padded=hw_padded)

    out = pl.pallas_call(
        kernel,
        out_shape=jax.ShapeDtypeStruct((rows, hw_padded), jnp.float32),
        grid_spec=pl.GridSpec(
            grid=grid,
            in_specs=[
                pl.BlockSpec(memory_space=pltpu.SMEM),                  # scale
                pl.BlockSpec(memory_space=pltpu.SMEM),                  # bias
                pl.BlockSpec((row_tile, hw_padded), lambda i: (i, 0)),  # x rows
            ],
            out_specs=pl.BlockSpec((row_tile, hw_padded), lambda i: (i, 0)),
        ),
        input_output_aliases={2: 0},   # output reuses the x2 HBM slab
        compiler_params=pltpu.CompilerParams(
            dimension_semantics=("parallel",),
            vmem_limit_bytes=int(vmem_limit),
        ),
    )(scale_arr, bias_arr, x2)

    if hw_padded != HW:
        out = out[:, :HW]
    return out.reshape(B, C, H, W)


def spatial_softmax_ref(x, temp, bias):
    B, C, H, W = x.shape
    z = jnp.exp(temp) * jnp.maximum(x.reshape(B, C, H * W), 0.0) + bias
    return jax.nn.softmax(z, axis=-1).reshape(x.shape)


if __name__ == "__main__":
    key = jax.random.PRNGKey(0)

    # Small shapes consistent with the module's NCHW conv-feature input.
    B, C, H, W = 2, 4, 16, 16
    x = jax.random.normal(key, (B, C, H, W), dtype=jnp.float32)

    # Deterministic parameter values (nn.Parameter scalars in the module).
    temp = jnp.float32(0.3)
    bias = jnp.float32(-0.1)

    # Reference first (kernel output aliases the input slab; keep the check
    # independent of any aliasing behavior).
    y_ref = jax.block_until_ready(spatial_softmax_ref(x, temp, bias))

    y = jax.block_until_ready(spatial_softmax(x, temp, bias))

    assert y.shape == x.shape and y.dtype == jnp.float32
    assert jnp.allclose(y, y_ref, atol=1e-6, rtol=1e-5), "mismatch vs reference"

    print("KERNEL_OK")
</pallas_src>

<mosaic_0001>
module attributes {stable_mosaic.version = 11 : i64} {
  func.func @_spatial_softmax_kernel(%arg0: i32, %arg1: memref<1xf32, #tpu.memory_space<smem>>, %arg2: memref<1xf32, #tpu.memory_space<smem>>, %arg3: memref<8x256xf32, #tpu.memory_space<vmem>>, %arg4: memref<8x256xf32, #tpu.memory_space<vmem>>) attributes {dimension_semantics = [#tpu.dimension_semantics<parallel>], iteration_bounds = array<i64: 1>, scalar_prefetch = 0 : i64, scratch_operands = 0 : i64, tpu.core_type = #tpu.core_type<tc>, window_params = [{transform_indices = @transform_0, window_bounds = array<i64: 1>}, {transform_indices = @transform_1, window_bounds = array<i64: 1>}, {transform_indices = @transform_2, window_bounds = array<i64: 8, 256>}, {transform_indices = @transform_3, window_bounds = array<i64: 8, 256>}]} {
    %c0 = arith.constant 0 : index
    %0 = memref.load %arg1[%c0] : memref<1xf32, #tpu.memory_space<smem>>
    %c0_0 = arith.constant 0 : index
    %1 = memref.load %arg2[%c0_0] : memref<1xf32, #tpu.memory_space<smem>>
    %c0_1 = arith.constant 0 : index
    %c0_2 = arith.constant 0 : index
    %2 = vector.load %arg3[%c0_1, %c0_2] : memref<8x256xf32, #tpu.memory_space<vmem>>, vector<8x256xf32>
    %cst = arith.constant 0.000000e+00 : f32
    %3 = vector.broadcast %cst : f32 to vector<8x256xf32>
    %4 = arith.maximumf %2, %3 : vector<8x256xf32>
    %5 = vector.broadcast %0 : f32 to vector<8x256xf32>
    %6 = arith.mulf %5, %4 : vector<8x256xf32>
    %7 = vector.broadcast %1 : f32 to vector<8x256xf32>
    %8 = arith.addf %6, %7 : vector<8x256xf32>
    %cst_3 = arith.constant dense<0xFF800000> : vector<8xf32>
    %9 = vector.multi_reduction <maximumf>, %8, %cst_3 [1] : vector<8x256xf32> to vector<8xf32>
    %10 = vector.shape_cast %9 : vector<8xf32> to vector<8x1xf32>
    %11 = vector.broadcast %10 : vector<8x1xf32> to vector<8x256xf32>
    %12 = arith.subf %8, %11 : vector<8x256xf32>
    %13 = math.exp %12 : vector<8x256xf32>
    %cst_4 = arith.constant dense<0.000000e+00> : vector<8xf32>
    %14 = vector.multi_reduction <add>, %13, %cst_4 [1] : vector<8x256xf32> to vector<8xf32>
    %15 = vector.shape_cast %14 : vector<8xf32> to vector<8x1xf32>
    %16 = tpu.reciprocal %15 : vector<8x1xf32> -> vector<8x1xf32>
    %17 = vector.broadcast %16 : vector<8x1xf32> to vector<8x256xf32>
    %18 = arith.mulf %13, %17 : vector<8x256xf32>
    %c0_5 = arith.constant 0 : index
    %c0_6 = arith.constant 0 : index
    %19 = vector.load %arg4[%c0_5, %c0_6] : memref<8x256xf32, #tpu.memory_space<vmem>>, vector<8x256xf32>
    tpu.vector_store %arg4[%c0_5, %c0_6], %18 {strides = array<i32>} : memref<8x256xf32, #tpu.memory_space<vmem>>, vector<8x256xf32>,
    return
  }
  func.func @transform_0(%arg0: i32) -> i32 {
    %c0_i32 = arith.constant 0 : i32
    %c0_i32_0 = arith.constant 0 : i32
    return %c0_i32 : i32
  }
  func.func @transform_1(%arg0: i32) -> i32 {
    %c0_i32 = arith.constant 0 : i32
    %c0_i32_0 = arith.constant 0 : i32
    return %c0_i32 : i32
  }
  func.func @transform_2(%arg0: i32) -> (i32, i32) {
    %c0_i32 = arith.constant 0 : i32
    %c0_i32_0 = arith.constant 0 : i32
    return %arg0, %c0_i32 : i32, i32
  }
  func.func @transform_3(%arg0: i32) -> (i32, i32) {
    %c0_i32 = arith.constant 0 : i32
    %c0_i32_0 = arith.constant 0 : i32
    return %arg0, %c0_i32 : i32, i32
  }
}

</mosaic_0001>

<bundles_post_ra>
// kernel: tpu_custom_call.1
= control target key start
LH: loop header
LB: loop body
LE: loop exit
PB: predicated region body
PF: predicated region fallthrough
CT: control target
= control target key end

     0   :  { %10 = vsyncpa [#allocation5], 0  ;;  %s181_s0 = inlined_call_operand.<no memory space> [shape: f32[1], index: 0, kind: input, shape index: {}]   ;;  %s182_s1 = inlined_call_operand.<no memory space> [shape: f32[1], index: 1, kind: input, shape index: {}]   ;;  %s183_s2 = inlined_call_operand.hbm [shape: f32[8,256], index: 2, kind: input, shape index: {}, may-alias: {2,3}]   ;;  %s184_s3 = inlined_call_operand.hbm [shape: f32[8,256], index: 3, kind: output, shape index: {}, may-alias: {2,3}]  }
   0x1   :  { %11 = vsyncpa [#allocation6], 0  ;;  %s129_s12 = smov [#allocation4]   ;;  %s81_s16 = scalar_lea.hbm %s183_s2, 256 }
   0x2   :  { %s22_s13 = sshll.u32 %s129_s12, 4  ;;  %p82_p0 = scmp.ne.s32.totalorder %s183_s2, %s81_s16  ;;  %s23_s13 = int_to_ptr.vmem [resolvable:$true] %s22_s13 }
   0x3   :  { %p85_p1 = scmp.lt.u32.totalorder %s81_s16, %s183_s2 }
   0x5   :  { %p87_p2 = pnand %p85_p1, %p82_p0 }
   0x7   :  { %90 = shalt.err (!%p87_p2)
}
   0x8   :  { %s91_s21 = scalar_lea.vmem %s23_s13, 256  ;;  %p96_p4 = scmp.lt.s32.totalorder %s23_s13, %s23_s13 }
   0x9   :  { %p92_p3 = scmp.ne.s32.totalorder %s23_s13, %s91_s21  ;;  %p97_p5 = scmp.lt.s32.totalorder %s91_s21, %s91_s21 }
   0xb   :  { %p98_p6 = por %p97_p5, %p96_p4 }
   0xd   :  { %p99_p7 = pnand %p98_p6, %p92_p3 }
   0xf   :  { %102 = shalt.err (!%p99_p7)
}
  0x10   :  { %25 = dma.hbm_to_vmem [thread:$0]  %s183_s2, 256, %s23_s13, [#allocation5]  }
  0x11   :  { %125 = dma.done.wait [#allocation5], 256  }
  0x12   :  { %126 = vsyncadd [#allocation5], 4294967040  ;;  %v31_v0 = vld [vmem:[#allocation4] sm:$0xff]  ;;  %v32_v1 = vld [vmem:[#allocation4 + $0x8] sm:$0xff]  ;;  %v35_v2 = vstv %s181_s0  ;;  %v38_v5 = vstv %s182_s1  ;;  %s130_s0 = smov [#allocation7]  }
  0x13   :  { %v33_v3 = vmax.f32 %v31_v0, 0.0  ;;  %v34_v4 = vmax.f32 %v32_v1, 0.0  ;;  %s64_s1 = sshll.u32 %s130_s0, 4  ;;  %s65_s1 = int_to_ptr.vmem [resolvable:$true] %s64_s1 }
  0x14   :  { %s103_s2 = scalar_lea.vmem %s65_s1, 256  ;;  %p108_p9 = scmp.lt.s32.totalorder %s65_s1, %s65_s1 }
  0x15   :  { %v36_v6 = vmul.f32 %v35_v2, %v33_v3  ;;  %v37_v7 = vmul.f32 %v35_v2, %v34_v4  ;;  %p104_p8 = scmp.ne.s32.totalorder %s65_s1, %s103_s2  ;;  %p109_p10 = scmp.lt.s32.totalorder %s103_s2, %s103_s2 }
  0x17   :  { %v39_v8 = vadd.f32 %v38_v5, %v36_v6  ;;  %v40_v9 = vadd.f32 %v38_v5, %v37_v7  ;;  %p110_p11 = por %p109_p10, %p108_p9 }
  0x19   :  { %v41_v10 = vmax.f32 %v39_v8, %v40_v9  ;;  %p111_p12 = pnand %p110_p11, %p104_p8 }
  0x1b   :  { %42 = vmax.xlane.f32.xlu0 %v41_v10 }
  0xa8   :  { %v43_v11 = vpop.xlane.xlu0 %42 }
  0xa9   :  { %v44_v12 = vsub.f32 %v39_v8, %v43_v11  ;;  %v45_v13 = vsub.f32 %v40_v9, %v43_v11 }
  0xab   :  { %v46_v14 = vmul.f32 1.442695, %v44_v12  ;;  %v48_v15 = vmul.f32 1.442695, %v45_v13 }
  0xad   :  { %75 = vpow2.f32 %v46_v14 }
  0xae   :  { %77 = vpow2.f32 %v48_v15 }
  0xb7   :  { %v76_v16 = vpop.eup %75 }
  0xb8   :  { %v78_v17 = vpop.eup %77 }
  0xb9   :  { %v50_v18 = vadd.f32 %v78_v17, %v76_v16 }
  0xbb   :  { %51 = vadd.xlane.f32.xlu0 %v50_v18 }
 0x148   :  { %v52_v19 = vpop.xlane.xlu0 %51 }
 0x149   :  { %79 = vrcp.f32 %v52_v19 }
 0x153   :  { %v80_v20 = vpop.eup %79 }
 0x154   :  { %v54_v21 = vmul.f32 %v80_v20, %v76_v16  ;;  %v55_v22 = vmul.f32 %v80_v20, %v78_v17 }
 0x156   :  { %56 = vst [vmem:[#allocation7] sm:$0xff] %v54_v21  ;;  %57 = vst [vmem:[#allocation7 + $0x8] sm:$0xff] %v55_v22 }
 0x157   :  { %114 = shalt.err (!%p111_p12)
}
 0x158   :  { %s115_s30 = scalar_lea.hbm %s184_s3, 256 }
 0x159   :  { %p116_p13 = scmp.ne.s32.totalorder %s184_s3, %s115_s30  ;;  %p119_p0 = scmp.lt.u32.totalorder %s115_s30, %s184_s3 }
 0x15b   :  { %p121_p1 = pnand %p119_p0, %p116_p13 }
 0x15d   :  { %124 = shalt.err (!%p121_p1)
}
 0x15e   :  { %67 = dma.vmem_to_hbm [thread:$0]  %s65_s1, 256, %s184_s3, [#allocation6]  }
 0x15f   :  { %127 = dma.done.wait [#allocation6], 256  }
 0x160   :  { %128 = vsyncadd [#allocation6], 4294967040 }
 0x161   :  { %71 = vsyncpa [#allocation5], 1 }
 0x162   :  { %72 = vsyncpa [#allocation6], 1 }

</bundles_post_ra>
